<compile_context>
chip_gen: v7x
topology: tpu7x:2x2x1
jax: 0.10.0
libtpu: 0.0.40
codegen_flags: <defaults>
</compile_context>

<pallas_src>
import functools

import jax
import jax.numpy as jnp
from jax.experimental import pallas as pl
from jax.experimental.pallas import tpu as pltpu


def _disc_kernel(xt_ref, w1_ref, b1_ref, w2_ref, b2_ref, w3_ref, b3_ref, o_ref):
    # All operands for one batch tile are resident in VMEM.
    xt = xt_ref[...]                     # (in_pad, block_b)   compute dtype
    w1 = w1_ref[...]                     # (h2_pad, in_pad)    compute dtype
    w2 = w2_ref[...]                     # (h_pad,  h2_pad)    compute dtype
    w3 = w3_ref[...]                     # (h_pad, 1)          f32
    b1 = b1_ref[...]                     # (h2_pad, 1)         f32
    b2 = b2_ref[...]                     # (h_pad, 1)          f32
    b3 = b3_ref[...]                     # (1, 1)              f32

    # Linear(input_dim -> 2*hidden) + ReLU   (MXU, f32 accumulation; epilogue f32)
    h1 = jnp.dot(w1, xt, preferred_element_type=jnp.float32) + b1
    h1 = jnp.maximum(h1, 0.0)

    # Linear(2*hidden -> hidden) + ReLU
    h2 = jnp.dot(w2, h1.astype(w2.dtype), preferred_element_type=jnp.float32) + b2
    h2 = jnp.maximum(h2, 0.0)

    # Linear(hidden -> 1) + Sigmoid.
    # VPU multiply + cross-sublane reduction: batch stays on lanes, no N=1
    # matmul, no masked store. Result is a lane-dense (1, block_b) row.
    logits = jnp.sum(h2 * w3, axis=0, keepdims=True) + b3
    o_ref[...] = jax.nn.sigmoid(logits).astype(o_ref.dtype)


def _pad_to(a, shape):
    pads = [(0, t - s) for s, t in zip(a.shape, shape)]
    return jnp.pad(a, pads)


def _round_up(n, m):
    return ((n + m - 1) // m) * m


@functools.partial(jax.jit, static_argnames=("block_b", "compute_dtype"))
def discriminator_forward(x, params, *, block_b=256, compute_dtype=jnp.float32):
    """x: (B, input_dim) float32. params in torch layout: w (out, in), b (out,)."""
    B, in_dim = x.shape
    w1, b1 = params["w1"], params["b1"]          # (2h, in), (2h,)
    w2, b2 = params["w2"], params["b2"]          # (h, 2h),  (h,)
    w3, b3 = params["w3"], params["b3"]          # (1, h),   (1,)
    h2_dim = w1.shape[0]
    h_dim = w2.shape[0]

    in_pad = _round_up(in_dim, 128)
    h2_pad = _round_up(h2_dim, 128)
    h_pad = _round_up(h_dim, 128)
    b_pad = _round_up(B, block_b)

    # Lane-padded, batch-on-lanes operands (layout plumbing, not compute).
    xt = _pad_to(x.T, (in_pad, b_pad)).astype(compute_dtype)
    w1p = _pad_to(w1, (h2_pad, in_pad)).astype(compute_dtype)
    w2p = _pad_to(w2, (h_pad, h2_pad)).astype(compute_dtype)
    b1p = _pad_to(b1[:, None], (h2_pad, 1)).astype(jnp.float32)
    b2p = _pad_to(b2[:, None], (h_pad, 1)).astype(jnp.float32)
    w3p = _pad_to(w3.reshape(-1, 1), (h_pad, 1)).astype(jnp.float32)
    b3p = b3.reshape(1, 1).astype(jnp.float32)

    grid = (pl.cdiv(b_pad, block_b),)

    in_specs = [
        pl.BlockSpec((in_pad, block_b), lambda i: (0, i)),   # x^T batch tile
        pl.BlockSpec(w1p.shape, lambda i: (0, 0)),
        pl.BlockSpec(b1p.shape, lambda i: (0, 0)),
        pl.BlockSpec(w2p.shape, lambda i: (0, 0)),
        pl.BlockSpec(b2p.shape, lambda i: (0, 0)),
        pl.BlockSpec(w3p.shape, lambda i: (0, 0)),
        pl.BlockSpec(b3p.shape, lambda i: (0, 0)),
    ]
    out_specs = pl.BlockSpec((1, block_b), lambda i: (0, i))  # lane-dense output

    elt = jnp.dtype(compute_dtype).itemsize
    cost = pl.CostEstimate(
        flops=2 * b_pad * (in_pad * h2_pad + h2_pad * h_pad + h_pad),
        transcendentals=b_pad,
        bytes_accessed=int(in_pad * b_pad * elt
                           + (h2_pad * in_pad + h_pad * h2_pad) * elt
                           + (h2_pad + h_pad + h_pad + 1) * 4
                           + b_pad * 4),
    )

    out = pl.pallas_call(
        _disc_kernel,
        out_shape=jax.ShapeDtypeStruct((1, b_pad), jnp.float32),
        grid_spec=pltpu.PrefetchScalarGridSpec(
            num_scalar_prefetch=0,
            grid=grid,
            in_specs=in_specs,
            out_specs=out_specs,
        ),
        compiler_params=pltpu.CompilerParams(
            dimension_semantics=("parallel",),
            vmem_limit_bytes=32 * 1024 * 1024,
        ),
        cost_estimate=cost,
    )(xt, w1p, b1p, w2p, b2p, w3p, b3p)

    # Back to the PyTorch (B, 1) layout; padded batch lanes are discarded.
    return out[0, :B][:, None].astype(x.dtype)


def init_discriminator_params(key, input_dim, hidden_dim):
    """torch.nn.Linear-style init; weights kept in torch (out, in) layout."""
    dims = [(hidden_dim * 2, input_dim),
            (hidden_dim, hidden_dim * 2),
            (1, hidden_dim)]
    params = {}
    for idx, (fan_out, fan_in) in enumerate(dims, start=1):
        key, kw, kb = jax.random.split(key, 3)
        bound = 1.0 / jnp.sqrt(jnp.float32(fan_in))
        params[f"w{idx}"] = jax.random.uniform(
            kw, (fan_out, fan_in), jnp.float32, -bound, bound)
        params[f"b{idx}"] = jax.random.uniform(
            kb, (fan_out,), jnp.float32, -bound, bound)
    return params


def _reference_forward(x, params):
    h1 = jnp.maximum(x @ params["w1"].T + params["b1"], 0.0)
    h2 = jnp.maximum(h1 @ params["w2"].T + params["b2"], 0.0)
    return jax.nn.sigmoid(h2 @ params["w3"].T + params["b3"])


if __name__ == "__main__":
    input_dim, hidden_dim, batch = 32, 32, 300   # ragged batch: pads to 2 tiles of 256

    key = jax.random.PRNGKey(0)
    key, kx = jax.random.split(key)
    x = jax.random.normal(kx, (batch, input_dim), jnp.float32)
    params = init_discriminator_params(key, input_dim, hidden_dim)

    ref = _reference_forward(x, params)

    # float32 path (exact wrt reference).
    out = discriminator_forward(x, params)
    out = jax.block_until_ready(out)
    assert out.shape == (batch, 1), out.shape
    assert jnp.allclose(out, ref, atol=1e-5, rtol=1e-5)

    # bfloat16 matmul-input path (v6e/v7x bandwidth/MXU win), f32 accumulation.
    out_bf16 = discriminator_forward(x, params, compute_dtype=jnp.bfloat16)
    out_bf16 = jax.block_until_ready(out_bf16)
    assert out_bf16.shape == (batch, 1), out_bf16.shape
    assert jnp.allclose(out_bf16, ref, atol=5e-2)

    print("KERNEL_OK")
</pallas_src>

<mosaic_0001>
module attributes {stable_mosaic.version = 11 : i64} {
  func.func @_disc_kernel(%arg0: i32, %arg1: memref<128x256xf32, #tpu.memory_space<vmem>>, %arg2: memref<128x128xf32, #tpu.memory_space<vmem>>, %arg3: memref<128x1xf32, #tpu.memory_space<vmem>>, %arg4: memref<128x128xf32, #tpu.memory_space<vmem>>, %arg5: memref<128x1xf32, #tpu.memory_space<vmem>>, %arg6: memref<128x1xf32, #tpu.memory_space<vmem>>, %arg7: memref<1x1xf32, #tpu.memory_space<vmem>>, %arg8: memref<1x256xf32, #tpu.memory_space<vmem>>) attributes {dimension_semantics = [#tpu.dimension_semantics<parallel>], iteration_bounds = array<i64: 2>, scalar_prefetch = 0 : i64, scratch_operands = 0 : i64, tpu.core_type = #tpu.core_type<tc>, window_params = [{transform_indices = @transform_0, window_bounds = array<i64: 128, 256>}, {pipeline_mode = #tpu.pipeline_mode<synchronous>, transform_indices = @transform_1, window_bounds = array<i64: 128, 128>}, {pipeline_mode = #tpu.pipeline_mode<synchronous>, transform_indices = @transform_2, window_bounds = array<i64: 128, 1>}, {pipeline_mode = #tpu.pipeline_mode<synchronous>, transform_indices = @transform_3, window_bounds = array<i64: 128, 128>}, {pipeline_mode = #tpu.pipeline_mode<synchronous>, transform_indices = @transform_4, window_bounds = array<i64: 128, 1>}, {pipeline_mode = #tpu.pipeline_mode<synchronous>, transform_indices = @transform_5, window_bounds = array<i64: 128, 1>}, {pipeline_mode = #tpu.pipeline_mode<synchronous>, transform_indices = @transform_6, window_bounds = array<i64: 1, 1>}, {transform_indices = @transform_7, window_bounds = array<i64: 1, 256>}]} {
    %c0 = arith.constant 0 : index
    %c0_0 = arith.constant 0 : index
    %0 = vector.load %arg1[%c0, %c0_0] : memref<128x256xf32, #tpu.memory_space<vmem>>, vector<128x256xf32>
    %c0_1 = arith.constant 0 : index
    %c0_2 = arith.constant 0 : index
    %1 = vector.load %arg2[%c0_1, %c0_2] : memref<128x128xf32, #tpu.memory_space<vmem>>, vector<128x128xf32>
    %c0_3 = arith.constant 0 : index
    %c0_4 = arith.constant 0 : index
    %2 = vector.load %arg4[%c0_3, %c0_4] : memref<128x128xf32, #tpu.memory_space<vmem>>, vector<128x128xf32>
    %c0_5 = arith.constant 0 : index
    %c0_6 = arith.constant 0 : index
    %3 = vector.load %arg6[%c0_5, %c0_6] : memref<128x1xf32, #tpu.memory_space<vmem>>, vector<128x1xf32>
    %c0_7 = arith.constant 0 : index
    %c0_8 = arith.constant 0 : index
    %4 = vector.load %arg3[%c0_7, %c0_8] : memref<128x1xf32, #tpu.memory_space<vmem>>, vector<128x1xf32>
    %c0_9 = arith.constant 0 : index
    %c0_10 = arith.constant 0 : index
    %5 = vector.load %arg5[%c0_9, %c0_10] : memref<128x1xf32, #tpu.memory_space<vmem>>, vector<128x1xf32>
    %c0_11 = arith.constant 0 : index
    %c0_12 = arith.constant 0 : index
    %6 = vector.load %arg7[%c0_11, %c0_12] : memref<1x1xf32, #tpu.memory_space<vmem>>, vector<1x1xf32>
    %cst = arith.constant dense<0.000000e+00> : vector<128x256xf32>
    %7 = tpu.matmul %1, %0, %cst {dimension_numbers = #tpu.dot_dimension_numbers<[1], [0], [0], [1], [0, 0, 1, 1], [], []>} : vector<128x128xf32>, vector<128x256xf32>, vector<128x256xf32> -> vector<128x256xf32>
    %8 = vector.broadcast %4 : vector<128x1xf32> to vector<128x256xf32>
    %9 = arith.addf %7, %8 : vector<128x256xf32>
    %cst_13 = arith.constant 0.000000e+00 : f32
    %10 = vector.broadcast %cst_13 : f32 to vector<128x256xf32>
    %11 = arith.maximumf %9, %10 : vector<128x256xf32>
    %cst_14 = arith.constant dense<0.000000e+00> : vector<128x256xf32>
    %12 = tpu.matmul %2, %11, %cst_14 {dimension_numbers = #tpu.dot_dimension_numbers<[1], [0], [0], [1], [0, 0, 1, 1], [], []>} : vector<128x128xf32>, vector<128x256xf32>, vector<128x256xf32> -> vector<128x256xf32>
    %13 = vector.broadcast %5 : vector<128x1xf32> to vector<128x256xf32>
    %14 = arith.addf %12, %13 : vector<128x256xf32>
    %cst_15 = arith.constant 0.000000e+00 : f32
    %15 = vector.broadcast %cst_15 : f32 to vector<128x256xf32>
    %16 = arith.maximumf %14, %15 : vector<128x256xf32>
    %17 = vector.broadcast %3 : vector<128x1xf32> to vector<128x256xf32>
    %18 = arith.mulf %16, %17 : vector<128x256xf32>
    %cst_16 = arith.constant dense<0.000000e+00> : vector<256xf32>
    %19 = vector.multi_reduction <add>, %18, %cst_16 [0] : vector<128x256xf32> to vector<256xf32>
    %20 = vector.shape_cast %19 : vector<256xf32> to vector<1x256xf32>
    %21 = vector.broadcast %6 : vector<1x1xf32> to vector<1x256xf32>
    %22 = arith.addf %20, %21 : vector<1x256xf32>
    %23 = arith.negf %22 : vector<1x256xf32>
    %24 = math.exp %23 : vector<1x256xf32>
    %cst_17 = arith.constant 1.000000e+00 : f32
    %25 = vector.broadcast %cst_17 : f32 to vector<1x256xf32>
    %26 = arith.addf %25, %24 : vector<1x256xf32>
    %27 = arith.divf %25, %26 : vector<1x256xf32>
    %c0_18 = arith.constant 0 : index
    %c0_19 = arith.constant 0 : index
    %28 = vector.load %arg8[%c0_18, %c0_19] : memref<1x256xf32, #tpu.memory_space<vmem>>, vector<1x256xf32>
    tpu.vector_store %arg8[%c0_18, %c0_19], %27 {strides = array<i32>} : memref<1x256xf32, #tpu.memory_space<vmem>>, vector<1x256xf32>,
    return
  }
  func.func @transform_0(%arg0: i32) -> (i32, i32) {
    %c0_i32 = arith.constant 0 : i32
    %c0_i32_0 = arith.constant 0 : i32
    return %c0_i32, %arg0 : i32, i32
  }
  func.func @transform_1(%arg0: i32) -> (i32, i32) {
    %c0_i32 = arith.constant 0 : i32
    %c0_i32_0 = arith.constant 0 : i32
    %c0_i32_1 = arith.constant 0 : i32
    return %c0_i32, %c0_i32_0 : i32, i32
  }
  func.func @transform_2(%arg0: i32) -> (i32, i32) {
    %c0_i32 = arith.constant 0 : i32
    %c0_i32_0 = arith.constant 0 : i32
    %c0_i32_1 = arith.constant 0 : i32
    return %c0_i32, %c0_i32_0 : i32, i32
  }
  func.func @transform_3(%arg0: i32) -> (i32, i32) {
    %c0_i32 = arith.constant 0 : i32
    %c0_i32_0 = arith.constant 0 : i32
    %c0_i32_1 = arith.constant 0 : i32
    return %c0_i32, %c0_i32_0 : i32, i32
  }
  func.func @transform_4(%arg0: i32) -> (i32, i32) {
    %c0_i32 = arith.constant 0 : i32
    %c0_i32_0 = arith.constant 0 : i32
    %c0_i32_1 = arith.constant 0 : i32
    return %c0_i32, %c0_i32_0 : i32, i32
  }
  func.func @transform_5(%arg0: i32) -> (i32, i32) {
    %c0_i32 = arith.constant 0 : i32
    %c0_i32_0 = arith.constant 0 : i32
    %c0_i32_1 = arith.constant 0 : i32
    return %c0_i32, %c0_i32_0 : i32, i32
  }
  func.func @transform_6(%arg0: i32) -> (i32, i32) {
    %c0_i32 = arith.constant 0 : i32
    %c0_i32_0 = arith.constant 0 : i32
    %c0_i32_1 = arith.constant 0 : i32
    return %c0_i32, %c0_i32_0 : i32, i32
  }
  func.func @transform_7(%arg0: i32) -> (i32, i32) {
    %c0_i32 = arith.constant 0 : i32
    %c0_i32_0 = arith.constant 0 : i32
    return %c0_i32, %arg0 : i32, i32
  }
}

</mosaic_0001>

<bundles_post_ra>
// kernel: discriminator_forward.1
= control target key start
LH: loop header
LB: loop body
LE: loop exit
PB: predicated region body
PF: predicated region fallthrough
CT: control target
= control target key end

     0   :  { %s1902_s0 = inlined_call_operand.vmem [shape: f32[128,512], index: 0, kind: input, shape index: {}]   ;;  %s1903_s1 = inlined_call_operand.vmem [shape: f32[128,128], index: 1, kind: input, shape index: {}]   ;;  %s1904_s2 = inlined_call_operand.vmem [shape: f32[128,1], index: 2, kind: input, shape index: {}]   ;;  %s1905_s3 = inlined_call_operand.vmem [shape: f32[128,128], index: 3, kind: input, shape index: {}]   ;;  %s1906_s4 = inlined_call_operand.vmem [shape: f32[128,1], index: 4, kind: input, shape index: {}]   ;;  %s1907_s5 = inlined_call_operand.vmem [shape: f32[128,1], index: 5, kind: input, shape index: {}]   ;;  %s1908_s6 = inlined_call_operand.<no memory space> [shape: f32[1,1], index: 6, kind: input, shape index: {}]   ;;  %s1909_s7 = inlined_call_operand.vmem [shape: f32[1,512], index: 7, kind: output, shape index: {}]  }
   0x1   :  { %v12_v0 = vstv %s1908_s6 }
   0x2   :  { %13 = vst [vmem:[#allocation2] sm:$0x1] %v12_v0 }
   0x3   :  { %s1464_s26 = smov 0   ;;  %s1466_s27 = smov 0  }
   0x4   :  { %s1468_s28 = smov 0  }
   0x5 LB: > { %s1278_s6 = sadd.s32 4294967295, %s1416_s28   ;;  %s1481_s29 = sadd.s32 1, %s1416_s28   ;;  %s1416_s28 = sphi %s1468_s28, %s1912_s28   ;;  %s1412_s27 = sphi %s1466_s27, %s1911_s27   ;;  %s1408_s26 = sphi %s1464_s26, %s1910_s26  }
   0x6   : > { %s23_s30 = ssub.s32 %s1416_s28, %s1481_s29  ;;  %s26_s8 = sadd.s32 1, %s1412_s27 }
   0x7   : > { %p24_p0 = scmp.eq.s32.totalorder %s23_s30, 0  ;;  %p33_p1 = scmp.ne.s32.totalorder %s1412_s27, %s1408_s26 }
   0x8   : > { %p34_p2 = scmp.eq.s32.totalorder %s1416_s28, 0  ;;  %p1281_p4 = scmp.ge.s32.totalorder %s1416_s28, 2 }
   0x9   : > { %s1490_s9 = scalar_select %p24_p0, %s1412_s27, %s26_s8  }
   0xa   : > { %p35_p3 = por %p34_p2, %p33_p1  ;;  %229 = sbr.rel (%p1281_p4) target bundleno = 37 (0x25), region = 40 }
  0x11   : > { %232 = sbr.rel (!%p35_p3) target bundleno = 37 (0x25), region = 44  ;;  %s234_s10 = sand.u32 (%p35_p3), 1, %s1412_s27  }
  0x12   : > { %s1292_s11 = sshll.u32 (%p35_p3), %s1416_s28, 4  ;;  %s1282_s12 = sshll.u32 (%p35_p3), %s234_s10, 8 }
  0x13   : > { %s1498_s15 = scalar_lea.vmem (%p35_p3), %s1902_s0, %s1292_s11  ;;  %s1503_s16 = scalar_lea.vmem (%p35_p3), [#allocation3], %s1282_s12 }
  0x14   : > { %v252_v1 = vld [vmem:[%s1498_s15] sm:$0xff] (%p35_p3)  ;;  %v254_v2 = vld [vmem:[%s1498_s15 + $0x8] sm:$0xff] (%p35_p3) }
  0x15   : > { %v256_v3 = vld [vmem:[%s1498_s15 + $0x20] sm:$0xff] (%p35_p3)  ;;  %253 = vst [vmem:[%s1503_s16] sm:$0xff] (%p35_p3), %v252_v1  ;;  %255 = vst [vmem:[%s1503_s16 + $0x8] sm:$0xff] (%p35_p3), %v254_v2  ;;  %v258_v4 = vld [vmem:[%s1498_s15 + $0x28] sm:$0xff] (%p35_p3) }
  0x16   : > { %257 = vst [vmem:[%s1503_s16 + $0x10] sm:$0xff] (%p35_p3), %v256_v3  ;;  %v260_v5 = vld [vmem:[%s1498_s15 + $0x40] sm:$0xff] (%p35_p3)  ;;  %v262_v6 = vld [vmem:[%s1498_s15 + $0x48] sm:$0xff] (%p35_p3)  ;;  %259 = vst [vmem:[%s1503_s16 + $0x18] sm:$0xff] (%p35_p3), %v258_v4 }
  0x17   : > { %261 = vst [vmem:[%s1503_s16 + $0x20] sm:$0xff] (%p35_p3), %v260_v5  ;;  %263 = vst [vmem:[%s1503_s16 + $0x28] sm:$0xff] (%p35_p3), %v262_v6  ;;  %v264_v7 = vld [vmem:[%s1498_s15 + $0x60] sm:$0xff] (%p35_p3)  ;;  %v266_v8 = vld [vmem:[%s1498_s15 + $0x68] sm:$0xff] (%p35_p3) }
  0x18   : > { %v268_v9 = vld [vmem:[%s1498_s15 + $0x80] sm:$0xff]  ;;  %265 = vst [vmem:[%s1503_s16 + $0x30] sm:$0xff] %v264_v7  ;;  %267 = vst [vmem:[%s1503_s16 + $0x38] sm:$0xff] %v266_v8  ;;  %v270_v10 = vld [vmem:[%s1498_s15 + $0x88] sm:$0xff] }
  0x19   : > { %269 = vst [vmem:[%s1503_s16 + $0x40] sm:$0xff] %v268_v9  ;;  %v272_v11 = vld [vmem:[%s1498_s15 + $0xa0] sm:$0xff]  ;;  %v274_v12 = vld [vmem:[%s1498_s15 + $0xa8] sm:$0xff]  ;;  %271 = vst [vmem:[%s1503_s16 + $0x48] sm:$0xff] %v270_v10 }
  0x1a   : > { %273 = vst [vmem:[%s1503_s16 + $0x50] sm:$0xff] %v272_v11  ;;  %275 = vst [vmem:[%s1503_s16 + $0x58] sm:$0xff] %v274_v12  ;;  %v276_v13 = vld [vmem:[%s1498_s15 + $0xc0] sm:$0xff]  ;;  %v278_v14 = vld [vmem:[%s1498_s15 + $0xc8] sm:$0xff] }
  0x1b   : > { %v280_v15 = vld [vmem:[%s1498_s15 + $0xe0] sm:$0xff]  ;;  %277 = vst [vmem:[%s1503_s16 + $0x60] sm:$0xff] %v276_v13  ;;  %279 = vst [vmem:[%s1503_s16 + $0x68] sm:$0xff] %v278_v14  ;;  %v282_v16 = vld [vmem:[%s1498_s15 + $0xe8] sm:$0xff] }
  0x1c   : > { %281 = vst [vmem:[%s1503_s16 + $0x70] sm:$0xff] %v280_v15  ;;  %v284_v17 = vld [vmem:[%s1498_s15 + $0x100] sm:$0xff]  ;;  %v286_v18 = vld [vmem:[%s1498_s15 + $0x108] sm:$0xff]  ;;  %283 = vst [vmem:[%s1503_s16 + $0x78] sm:$0xff] %v282_v16 }
  0x1d   : > { %285 = vst [vmem:[%s1503_s16 + $0x80] sm:$0xff] %v284_v17  ;;  %287 = vst [vmem:[%s1503_s16 + $0x88] sm:$0xff] %v286_v18  ;;  %v288_v19 = vld [vmem:[%s1498_s15 + $0x120] sm:$0xff]  ;;  %v290_v20 = vld [vmem:[%s1498_s15 + $0x128] sm:$0xff] }
  0x1e   : > { %v292_v21 = vld [vmem:[%s1498_s15 + $0x140] sm:$0xff]  ;;  %289 = vst [vmem:[%s1503_s16 + $0x90] sm:$0xff] %v288_v19  ;;  %291 = vst [vmem:[%s1503_s16 + $0x98] sm:$0xff] %v290_v20  ;;  %v294_v22 = vld [vmem:[%s1498_s15 + $0x148] sm:$0xff] }
  0x1f   : > { %293 = vst [vmem:[%s1503_s16 + $0xa0] sm:$0xff] %v292_v21  ;;  %v296_v23 = vld [vmem:[%s1498_s15 + $0x160] sm:$0xff]  ;;  %v298_v24 = vld [vmem:[%s1498_s15 + $0x168] sm:$0xff]  ;;  %295 = vst [vmem:[%s1503_s16 + $0xa8] sm:$0xff] %v294_v22 }
  0x20   : > { %297 = vst [vmem:[%s1503_s16 + $0xb0] sm:$0xff] %v296_v23  ;;  %299 = vst [vmem:[%s1503_s16 + $0xb8] sm:$0xff] %v298_v24  ;;  %v300_v25 = vld [vmem:[%s1498_s15 + $0x180] sm:$0xff]  ;;  %v302_v26 = vld [vmem:[%s1498_s15 + $0x188] sm:$0xff] }
  0x21   : > { %v304_v27 = vld [vmem:[%s1498_s15 + $0x1a0] sm:$0xff]  ;;  %301 = vst [vmem:[%s1503_s16 + $0xc0] sm:$0xff] %v300_v25  ;;  %303 = vst [vmem:[%s1503_s16 + $0xc8] sm:$0xff] %v302_v26  ;;  %v306_v28 = vld [vmem:[%s1498_s15 + $0x1a8] sm:$0xff] }
  0x22   : > { %305 = vst [vmem:[%s1503_s16 + $0xd0] sm:$0xff] %v304_v27  ;;  %v308_v29 = vld [vmem:[%s1498_s15 + $0x1c0] sm:$0xff]  ;;  %v310_v30 = vld [vmem:[%s1498_s15 + $0x1c8] sm:$0xff]  ;;  %307 = vst [vmem:[%s1503_s16 + $0xd8] sm:$0xff] %v306_v28 }
  0x23   : > { %309 = vst [vmem:[%s1503_s16 + $0xe0] sm:$0xff] %v308_v29  ;;  %311 = vst [vmem:[%s1503_s16 + $0xe8] sm:$0xff] %v310_v30  ;;  %v312_v31 = vld [vmem:[%s1498_s15 + $0x1e0] sm:$0xff]  ;;  %v314_v32 = vld [vmem:[%s1498_s15 + $0x1e8] sm:$0xff] }
  0x24   : > { %313 = vst [vmem:[%s1503_s16 + $0xf0] sm:$0xff] %v312_v31  ;;  %315 = vst [vmem:[%s1503_s16 + $0xf8] sm:$0xff] %v314_v32 }
  0x25 PF: > { %p1285_p5 = scmp.ge.s32.totalorder %s1416_s28, 1  ;;  %p320_p6 = scmp.lt.s32.totalorder %s1416_s28, 3 }
  0x27   : > { %p321_p7 = pnand %p1285_p5, %p320_p6 }
  0x28   : > { %s327_s17 = sand.u32 (!%p321_p7), 1, %s1408_s26   ;;  %v1418_v33 = vmov (!%p321_p7), 0.0   ;;  %v1419_v34 = vmov (!%p321_p7), 0   ;;  %v443_v35 = vld [vmem:[%s1904_s2] sm:$0xff] (!%p321_p7)  ;;  %v444_v36 = vld [vmem:[%s1904_s2 + $0x8] sm:$0xff] (!%p321_p7)  ;;  %v445_v62 = vld [vmem:[%s1904_s2 + $0x10] sm:$0xff] (!%p321_p7) }
  0x29   : > { %324 = sbr.rel (%p321_p7) target bundleno = 689 (0x2b1), region = 67  ;;  %s1286_s18 = sshll.u32 (!%p321_p7), %s327_s17, 8  ;;  %620 = vmatprep.mubr.f32.mxu0 (!%p321_p7), %v1418_v33  ;;  %1384 = vset.pattern.permute.xlu0 (!%p321_p7), %v1419_v34  ;;  %v447_v63 = vld [vmem:[%s1904_s2 + $0x20] sm:$0xff] (!%p321_p7)  ;;  %v446_v1 = vld [vmem:[%s1904_s2 + $0x18] sm:$0xff] (!%p321_p7)  ;;  %v449_v5 = vld [vmem:[%s1904_s2 + $0x30] sm:$0xff] (!%p321_p7) }
  0x2a   : > { %478 = vperm.xlu0 (!%p321_p7), %1384, %v443_v35   ;;  %1385 = vset.pattern.permute.xlu1 (!%p321_p7), %v1419_v34  ;;  %s1576_s23 = scalar_lea.vmem (!%p321_p7), [#allocation3], %s1286_s18  ;;  %v448_v9 = vld [vmem:[%s1904_s2 + $0x28] sm:$0xff] (!%p321_p7)  ;;  %v451_v13 = vld [vmem:[%s1904_s2 + $0x40] sm:$0xff] (!%p321_p7)  ;;  %v450_v17 = vld [vmem:[%s1904_s2 + $0x38] sm:$0xff] (!%p321_p7)  ;;  %s1287_s10 = sshll.u32 (!%p321_p7), %s1278_s6, 1 }
  0x2b   : > { %v364_v37 = vld [vmem:[%s1576_s23 + $0x8] sm:$0xff] (!%p321_p7)  ;;  %v366_v38 = vld [vmem:[%s1576_s23 + $0x18] sm:$0xff] (!%p321_p7)  ;;  %v363_v39 = vld [vmem:[%s1576_s23] sm:$0xff] (!%p321_p7)  ;;  %893 = vmatprep.mubr.f32.mxu1 (!%p321_p7), %v1418_v33  ;;  %488 = vperm.xlu1 (!%p321_p7), %1385, %v445_v62   ;;  %p359_p8 = scmp.lt.s32.totalorder (!%p321_p7), %s1287_s10, 3 }
  0x2c   : > { %v1293_v40 = vpack.c.bf16 (!%p321_p7), %v366_v38, %v364_v37  ;;  %v365_v41 = vld [vmem:[%s1576_s23 + $0x10] sm:$0xff] (!%p321_p7)  ;;  %v368_v42 = vld [vmem:[%s1576_s23 + $0x28] sm:$0xff] (!%p321_p7)  ;;  %v370_v43 = vld [vmem:[%s1576_s23 + $0x38] sm:$0xff] (!%p321_p7) }
  0x2d   : > { %v1295_v44 = vpack.c.bf16 (!%p321_p7), %v365_v41, %v363_v39  ;;  %v1297_v45 = vpack.c.bf16 (!%p321_p7), %v370_v43, %v368_v42  ;;  %v367_v46 = vld [vmem:[%s1576_s23 + $0x20] sm:$0xff] (!%p321_p7)  ;;  %v369_v47 = vld [vmem:[%s1576_s23 + $0x30] sm:$0xff] (!%p321_p7)  ;;  %v372_v48 = vld [vmem:[%s1576_s23 + $0x48] sm:$0xff] (!%p321_p7) }
  0x2e   : > { %1294 = vmatprep.subr.bf16.mxu0 (!%p321_p7), %v1293_v40  ;;  %v374_v49 = vld [vmem:[%s1576_s23 + $0x58] sm:$0xff] (!%p321_p7)  ;;  %483 = vperm.xlu0 (!%p321_p7), %1384, %v444_v36   ;;  %v1299_v50 = vpack.c.bf16 (!%p321_p7), %v369_v47, %v367_v46  ;;  %v371_v52 = vld [vmem:[%s1576_s23 + $0x40] sm:$0xff] (!%p321_p7)  ;;  %v373_v53 = vld [vmem:[%s1576_s23 + $0x50] sm:$0xff] (!%p321_p7) }
  0x2f   : > { %1296 = vmatpush1.bf16.msra.mxu0 (!%p321_p7), %v1295_v44  ;;  %v1301_v51 = vpack.c.bf16 (!%p321_p7), %v374_v49, %v372_v48  ;;  %v376_v54 = vld [vmem:[%s1576_s23 + $0x68] sm:$0xff] (!%p321_p7)  ;;  %v378_v55 = vld [vmem:[%s1576_s23 + $0x78] sm:$0xff] (!%p321_p7)  ;;  %v1303_v56 = vpack.c.bf16 (!%p321_p7), %v373_v53, %v371_v52  ;;  %v375_v58 = vld [vmem:[%s1576_s23 + $0x60] sm:$0xff] (!%p321_p7)  ;;  %493 = vperm.xlu1 (!%p321_p7), %1385, %v446_v1  }
  0x30   : > { %1298 = vmatprep.subr.bf16.mxu0 %v1297_v45  ;;  %v1305_v57 = vpack.c.bf16 %v378_v55, %v376_v54  ;;  %v377_v59 = vld [vmem:[%s1576_s23 + $0x70] sm:$0xff]  ;;  %v380_v60 = vld [vmem:[%s1576_s23 + $0x88] sm:$0xff]  ;;  %v382_v61 = vld [vmem:[%s1576_s23 + $0x98] sm:$0xff]  ;;  %s1914_s10 = smov (!%p359_p8, %s1287_s10), 3 }
  0x31   : > { %v1307_v0 = vpack.c.bf16 %v377_v59, %v375_v58  ;;  %v1309_v2 = vpack.c.bf16 %v382_v61, %v380_v60  ;;  %v379_v3 = vld [vmem:[%s1576_s23 + $0x80] sm:$0xff]  ;;  %v381_v4 = vld [vmem:[%s1576_s23 + $0x90] sm:$0xff]  ;;  %v384_v6 = vld [vmem:[%s1576_s23 + $0xa8] sm:$0xff]  ;;  %s361_s12 = scalar_lea.vmem %s1909_s7, %s1914_s10 }
  0x32   : > { %498 = vperm.xlu0 %1384, %v447_v63   ;;  %v386_v7 = vld [vmem:[%s1576_s23 + $0xb8] sm:$0xff]  ;;  %v1311_v8 = vpack.c.bf16 %v381_v4, %v379_v3  ;;  %v383_v11 = vld [vmem:[%s1576_s23 + $0xa0] sm:$0xff]  ;;  %v385_v12 = vld [vmem:[%s1576_s23 + $0xb0] sm:$0xff] }
  0x33   : > { %1300 = vmatpush1.bf16.msra.mxu0 %v1299_v50  ;;  %v1313_v10 = vpack.c.bf16 %v386_v7, %v384_v6  ;;  %v388_v14 = vld [vmem:[%s1576_s23 + $0xc8] sm:$0xff]  ;;  %v390_v15 = vld [vmem:[%s1576_s23 + $0xd8] sm:$0xff]  ;;  %503 = vperm.xlu1 %1385, %v448_v9   ;;  %v1315_v16 = vpack.c.bf16 %v385_v12, %v383_v11  ;;  %v387_v19 = vld [vmem:[%s1576_s23 + $0xc0] sm:$0xff] }
  0x34   : > { %1302 = vmatprep.subr.bf16.mxu0 %v1301_v51  ;;  %v1317_v18 = vpack.c.bf16 %v390_v15, %v388_v14  ;;  %v389_v20 = vld [vmem:[%s1576_s23 + $0xd0] sm:$0xff]  ;;  %v392_v22 = vld [vmem:[%s1576_s23 + $0xe8] sm:$0xff]  ;;  %v394_v23 = vld [vmem:[%s1576_s23 + $0xf8] sm:$0xff] }
  0x35   : > { %v453_v21 = vld [vmem:[%s1904_s2 + $0x50] sm:$0xff]  ;;  %v1319_v24 = vpack.c.bf16 %v389_v20, %v387_v19  ;;  %v452_v25 = vld [vmem:[%s1904_s2 + $0x48] sm:$0xff]  ;;  %v1321_v26 = vpack.c.bf16 %v394_v23, %v392_v22  ;;  %v455_v29 = vld [vmem:[%s1904_s2 + $0x60] sm:$0xff] }
  0x36   : > { %508 = vperm.xlu0 %1384, %v449_v5   ;;  %v391_v27 = vld [vmem:[%s1576_s23 + $0xe0] sm:$0xff]  ;;  %v393_v28 = vld [vmem:[%s1576_s23 + $0xf0] sm:$0xff]  ;;  %v475_v19 = vld [vmem:[#allocation2] sm:$0x1] }
  0x37   : > { %1304 = vmatpush1.bf16.msra.mxu0 %v1303_v56  ;;  %513 = vperm.xlu1 %1385, %v450_v17   ;;  %v1323_v30 = vpack.c.bf16 %v393_v28, %v391_v27  ;;  %v454_v31 = vld [vmem:[%s1904_s2 + $0x58] sm:$0xff]  ;;  %v457_v32 = vld [vmem:[%s1904_s2 + $0x70] sm:$0xff]  ;;  %v395_v34 = vld [vmem:[%s1903_s1] sm:$0xff] }
  0x38   : > { %1306 = vmatprep.subr.bf16.mxu0 %v1305_v57  ;;  %v456_v35 = vld [vmem:[%s1904_s2 + $0x68] sm:$0xff]  ;;  %v459_v36 = vld [vmem:[%s1906_s4] sm:$0xff]  ;;  %v458_v38 = vld [vmem:[%s1904_s2 + $0x78] sm:$0xff] }
  0x39   : > { %v396_v37 = vld [vmem:[%s1903_s1 + $0x8] sm:$0xff]  ;;  %v461_v39 = vld [vmem:[%s1906_s4 + $0x10] sm:$0xff]  ;;  %v427_v42 = vld [vmem:[%s1907_s5] sm:$0xff] }
  0x3a   : > { %518 = vperm.xlu0 %1384, %v451_v13   ;;  %v397_v40 = vld [vmem:[%s1903_s1 + $0x10] sm:$0xff]  ;;  %v460_v41 = vld [vmem:[%s1906_s4 + $0x8] sm:$0xff]  ;;  %v398_v43 = vld [vmem:[%s1903_s1 + $0x18] sm:$0xff] }
  0x3b   : > { %1308 = vmatpush1.bf16.msra.mxu0 %v1307_v0  ;;  %523 = vperm.xlu1 %1385, %v452_v25   ;;  %v462_v44 = vld [vmem:[%s1906_s4 + $0x18] sm:$0xff]  ;;  %v463_v45 = vld [vmem:[%s1906_s4 + $0x20] sm:$0xff]  ;;  %v428_v47 = vld [vmem:[%s1907_s5 + $0x8] sm:$0xff] }
  0x3c   : > { %1310 = vmatprep.subr.bf16.mxu0 %v1309_v2  ;;  %v399_v46 = vld [vmem:[%s1903_s1 + $0x20] sm:$0xff]  ;;  %v464_v48 = vld [vmem:[%s1906_s4 + $0x28] sm:$0xff]  ;;  %v429_v50 = vld [vmem:[%s1907_s5 + $0x10] sm:$0xff] }
  0x3d   : > { %v400_v49 = vld [vmem:[%s1903_s1 + $0x28] sm:$0xff]  ;;  %v465_v51 = vld [vmem:[%s1906_s4 + $0x30] sm:$0xff]  ;;  %v430_v53 = vld [vmem:[%s1907_s5 + $0x18] sm:$0xff] }
  0x3e   : > { %528 = vperm.xlu0 %1384, %v453_v21   ;;  %v401_v52 = vld [vmem:[%s1903_s1 + $0x30] sm:$0xff]  ;;  %v466_v54 = vld [vmem:[%s1906_s4 + $0x38] sm:$0xff]  ;;  %v431_v56 = vld [vmem:[%s1907_s5 + $0x20] sm:$0xff] }
  0x3f   : > { %1312 = vmatpush1.bf16.msra.mxu0 %v1311_v8  ;;  %533 = vperm.xlu1 %1385, %v454_v31   ;;  %v402_v55 = vld [vmem:[%s1903_s1 + $0x38] sm:$0xff]  ;;  %v467_v57 = vld [vmem:[%s1906_s4 + $0x40] sm:$0xff]  ;;  %v432_v59 = vld [vmem:[%s1907_s5 + $0x28] sm:$0xff] }
  0x40   : > { %1314 = vmatprep.subr.bf16.mxu0 %v1313_v10  ;;  %v403_v58 = vld [vmem:[%s1903_s1 + $0x40] sm:$0xff]  ;;  %v468_v60 = vld [vmem:[%s1906_s4 + $0x48] sm:$0xff]  ;;  %v433_v62 = vld [vmem:[%s1907_s5 + $0x30] sm:$0xff] }
  0x41   : > { %v404_v61 = vld [vmem:[%s1903_s1 + $0x48] sm:$0xff]  ;;  %v469_v63 = vld [vmem:[%s1906_s4 + $0x50] sm:$0xff]  ;;  %v434_v1 = vld [vmem:[%s1907_s5 + $0x38] sm:$0xff] }
  0x42   : > { %538 = vperm.xlu0 %1384, %v455_v29   ;;  %v405_v0 = vld [vmem:[%s1903_s1 + $0x50] sm:$0xff]  ;;  %v470_v2 = vld [vmem:[%s1906_s4 + $0x58] sm:$0xff]  ;;  %v435_v4 = vld [vmem:[%s1907_s5 + $0x40] sm:$0xff] }
  0x43   : > { %1316 = vmatpush1.bf16.msra.mxu0 %v1315_v16  ;;  %543 = vperm.xlu1 %1385, %v456_v35   ;;  %v406_v3 = vld [vmem:[%s1903_s1 + $0x58] sm:$0xff]  ;;  %v471_v5 = vld [vmem:[%s1906_s4 + $0x60] sm:$0xff]  ;;  %v436_v7 = vld [vmem:[%s1907_s5 + $0x48] sm:$0xff] }
  0x44   : > { %1318 = vmatprep.subr.bf16.mxu0 %v1317_v18  ;;  %v407_v6 = vld [vmem:[%s1903_s1 + $0x60] sm:$0xff]  ;;  %v472_v8 = vld [vmem:[%s1906_s4 + $0x68] sm:$0xff]  ;;  %v437_v10 = vld [vmem:[%s1907_s5 + $0x50] sm:$0xff] }
  0x45   : > { %v408_v9 = vld [vmem:[%s1903_s1 + $0x68] sm:$0xff]  ;;  %v473_v11 = vld [vmem:[%s1906_s4 + $0x70] sm:$0xff]  ;;  %v438_v13 = vld [vmem:[%s1907_s5 + $0x58] sm:$0xff] }
  0x46   : > { %548 = vperm.xlu0 %1384, %v457_v32   ;;  %v409_v12 = vld [vmem:[%s1903_s1 + $0x70] sm:$0xff]  ;;  %v474_v14 = vld [vmem:[%s1906_s4 + $0x78] sm:$0xff]  ;;  %v439_v16 = vld [vmem:[%s1907_s5 + $0x60] sm:$0xff] }
  0x47   : > { %1320 = vmatpush1.bf16.msra.mxu0 %v1319_v24  ;;  %553 = vperm.xlu1 %1385, %v458_v38   ;;  %v410_v15 = vld [vmem:[%s1903_s1 + $0x78] sm:$0xff]  ;;  %v441_v17 = vld [vmem:[%s1907_s5 + $0x70] sm:$0xff]  ;;  %v440_v18 = vld [vmem:[%s1907_s5 + $0x68] sm:$0xff] }
  0x48   : > { %1322 = vmatprep.subr.bf16.mxu0 %v1321_v26  ;;  %v442_v20 = vld [vmem:[%s1907_s5 + $0x78] sm:$0xff] }
  0x4a   : > { %751 = vperm.xlu0 %1384, %v459_v36  }
  0x4b   : > { %1324 = vmatpush1.bf16.msra.mxu0 %v1323_v30  ;;  %756 = vperm.xlu1 %1385, %v460_v41  }
  0x4e   : > { %621 = vmatmul.mubr.f32.vlgmr.msra.gmra.mrb[0].mxu0 %v395_v34  ;;  %761 = vperm.xlu0 %1384, %v461_v39  }
  0x4f   : > { %626 = vmatprep.mubr.f32.mxu0 %v1418_v33  ;;  %766 = vperm.xlu1 %1385, %v462_v44  }
  0x52   : > { %627 = vmatmul.mubr.f32.gmra.mrb[2].mxu0 %v396_v37  ;;  %1024 = vperm.xlu0 %1384, %v427_v42  }
  0x53   : > { %632 = vmatprep.mubr.f32.mxu0 %v1418_v33  ;;  %1029 = vperm.xlu1 %1385, %v428_v47  }
  0x56   : > { %633 = vmatmul.mubr.f32.gmra.mrb[4].mxu0 %v397_v40  ;;  %771 = vperm.xlu0 %1384, %v463_v45  }
  0x57   : > { %638 = vmatprep.mubr.f32.mxu0 %v1418_v33  ;;  %1034 = vperm.xlu1 %1385, %v429_v50  }
  0x5a   : > { %639 = vmatmul.mubr.f32.gmra.mrb[6].mxu0 %v398_v43  ;;  %776 = vperm.xlu0 %1384, %v464_v48  }
  0x5b   : > { %644 = vmatprep.mubr.f32.mxu0 %v1418_v33  ;;  %1039 = vperm.xlu1 %1385, %v430_v53  }
  0x5e   : > { %645 = vmatmul.mubr.f32.gmra.mrb[8].mxu0 %v399_v46  ;;  %781 = vperm.xlu0 %1384, %v465_v51  }
  0x5f   : > { %650 = vmatprep.mubr.f32.mxu0 %v1418_v33  ;;  %1044 = vperm.xlu1 %1385, %v431_v56  }
  0x62   : > { %651 = vmatmul.mubr.f32.gmra.mrb[10].mxu0 %v400_v49  ;;  %786 = vperm.xlu0 %1384, %v466_v54  }
  0x63   : > { %656 = vmatprep.mubr.f32.mxu0 %v1418_v33  ;;  %1049 = vperm.xlu1 %1385, %v432_v59  }
  0x66   : > { %657 = vmatmul.mubr.f32.gmra.mrb[12].mxu0 %v401_v52  ;;  %791 = vperm.xlu0 %1384, %v467_v57  }
  0x67   : > { %662 = vmatprep.mubr.f32.mxu0 %v1418_v33  ;;  %1054 = vperm.xlu1 %1385, %v433_v62  }
  0x6a   : > { %663 = vmatmul.mubr.f32.gmra.mrb[14].mxu0 %v402_v55  ;;  %796 = vperm.xlu0 %1384, %v468_v60  }
  0x6b   : > { %668 = vmatprep.mubr.f32.mxu0 %v1418_v33  ;;  %1059 = vperm.xlu1 %1385, %v434_v1  }
  0x6e   : > { %669 = vmatmul.mubr.f32.gmra.mrb[16].mxu0 %v403_v58  ;;  %801 = vperm.xlu0 %1384, %v469_v63  }
  0x6f   : > { %674 = vmatprep.mubr.f32.mxu0 %v1418_v33  ;;  %1064 = vperm.xlu1 %1385, %v435_v4  }
  0x72   : > { %675 = vmatmul.mubr.f32.gmra.mrb[18].mxu0 %v404_v61  ;;  %806 = vperm.xlu0 %1384, %v470_v2  }
  0x73   : > { %680 = vmatprep.mubr.f32.mxu0 %v1418_v33  ;;  %1069 = vperm.xlu1 %1385, %v436_v7  }
  0x76   : > { %681 = vmatmul.mubr.f32.gmra.mrb[20].mxu0 %v405_v0  ;;  %811 = vperm.xlu0 %1384, %v471_v5  }
  0x77   : > { %686 = vmatprep.mubr.f32.mxu0 %v1418_v33  ;;  %1074 = vperm.xlu1 %1385, %v437_v10  }
  0x7a   : > { %687 = vmatmul.mubr.f32.gmra.mrb[22].mxu0 %v406_v3  ;;  %816 = vperm.xlu0 %1384, %v472_v8  }
  0x7b   : > { %692 = vmatprep.mubr.f32.mxu0 %v1418_v33  ;;  %1079 = vperm.xlu1 %1385, %v438_v13  }
  0x7e   : > { %693 = vmatmul.mubr.f32.gmra.mrb[24].mxu0 %v407_v6  ;;  %821 = vperm.xlu0 %1384, %v473_v11  }
  0x7f   : > { %698 = vmatprep.mubr.f32.mxu0 %v1418_v33  ;;  %1084 = vperm.xlu1 %1385, %v439_v16  }
  0x82   : > { %699 = vmatmul.mubr.f32.gmra.mrb[26].mxu0 %v408_v9  ;;  %826 = vperm.xlu0 %1384, %v474_v14  }
  0x83   : > { %704 = vmatprep.mubr.f32.mxu0 %v1418_v33  ;;  %1089 = vperm.xlu1 %1385, %v440_v18  }
  0x86   : > { %705 = vmatmul.mubr.f32.gmra.mrb[28].mxu0 %v409_v12  ;;  %1094 = vperm.xlu0 %1384, %v441_v17  }
  0x87   : > { %710 = vmatprep.mubr.f32.mxu0 %v1418_v33  ;;  %1099 = vperm.xlu1 %1385, %v442_v20  }
  0x8a   : > { %711 = vmatmul.mubr.f32.gmra.mrb[30].mxu0 %v410_v15  ;;  %1178 = vperm.xlu0 %1384, %v475_v19  }
  0xa9   : > { %v479_v21 = vpop.permute.xlu0 %478 }
  0xaa   : > { %v489_v30 = vpop.permute.xlu1 %488 }
  0xad   : > { %v484_v25 = vpop.permute.xlu0 %483 }
  0xae   : > { %v494_v42 = vpop.permute.xlu1 %493 }
  0xb1   : > { %v499_v55 = vpop.permute.xlu0 %498 }
  0xb2   : > { %v504_v58 = vpop.permute.xlu1 %503 }
  0xb5   : > { %v509_v7 = vpop.permute.xlu0 %508 }
  0xb6   : > { %v514_v10 = vpop.permute.xlu1 %513 }
 0x121   : > { %v622_v22 = vpop.f32.mrb[0].mxu0 }
 0x122   : > { %v624_v23 = vpop.f32.mrb[1].mxu0  ;;  %v623_v24 = vadd.f32 %v622_v22, %v479_v21 }
 0x123   : > { %v625_v26 = vadd.f32 %v624_v23, %v479_v21  ;;  %v519_v23 = vpop.permute.xlu0 %518 }
 0x124   : > { %v717_v32 = vmax.f32 %v623_v24, 0.0 }
 0x125   : > { %v628_v27 = vpop.f32.mrb[2].mxu0  ;;  %v718_v35 = vmax.f32 %v625_v26, 0.0  ;;  %v524_v26 = vpop.permute.xlu1 %523 }
 0x126   : > { %v629_v28 = vadd.f32 %v628_v27, %v484_v25  ;;  %v630_v29 = vpop.f32.mrb[3].mxu0 }
 0x127   : > { %v631_v31 = vadd.f32 %v630_v29, %v484_v25 }
 0x128   : > { %v719_v34 = vmax.f32 %v629_v28, 0.0 }
 0x129   : > { %v720_v36 = vmax.f32 %v631_v31, 0.0  ;;  %v634_v37 = vpop.f32.mrb[4].mxu0 }
 0x12a   : > { %v636_v38 = vpop.f32.mrb[5].mxu0  ;;  %v1327_v39 = vpack.c.bf16 %v719_v34, %v717_v32  ;;  %v635_v41 = vadd.f32 %v634_v37, %v489_v30 }
 0x12b   : > { %v1325_v40 = vpack.c.bf16 %v720_v36, %v718_v35  ;;  %v637_v43 = vadd.f32 %v636_v38, %v489_v30 }
 0x12c   : > { %v721_v48 = vmax.f32 %v635_v41, 0.0 }
 0x12d   : > { %v640_v44 = vpop.f32.mrb[6].mxu0  ;;  %1326 = vmatprep.subr.bf16.mxu1 %v1325_v40  ;;  %v722_v50 = vmax.f32 %v637_v43, 0.0  ;;  %v529_v40 = vpop.permute.xlu0 %528 }
 0x12e   : > { %v641_v45 = vadd.f32 %v640_v44, %v494_v42  ;;  %v642_v46 = vpop.f32.mrb[7].mxu0  ;;  %1328 = vmatpush1.bf16.msra.mxu1 %v1327_v39  ;;  %v534_v43 = vpop.permute.xlu1 %533 }
 0x12f   : > { %v643_v47 = vadd.f32 %v642_v46, %v494_v42 }
 0x130   : > { %v723_v49 = vmax.f32 %v641_v45, 0.0 }
 0x131   : > { %v724_v51 = vmax.f32 %v643_v47, 0.0  ;;  %v646_v52 = vpop.f32.mrb[8].mxu0 }
 0x132   : > { %v1331_v53 = vpack.c.bf16 %v723_v49, %v721_v48  ;;  %v648_v54 = vpop.f32.mrb[9].mxu0  ;;  %v647_v57 = vadd.f32 %v646_v52, %v499_v55 }
 0x133   : > { %v1329_v56 = vpack.c.bf16 %v724_v51, %v722_v50  ;;  %v649_v59 = vadd.f32 %v648_v54, %v499_v55 }
 0x134   : > { %v725_v0 = vmax.f32 %v647_v57, 0.0 }
 0x135   : > { %v652_v60 = vpop.f32.mrb[10].mxu0  ;;  %1330 = vmatprep.subr.bf16.mxu1 %v1329_v56  ;;  %v726_v2 = vmax.f32 %v649_v59, 0.0  ;;  %v539_v56 = vpop.permute.xlu0 %538 }
 0x136   : > { %v653_v61 = vadd.f32 %v652_v60, %v504_v58  ;;  %v654_v62 = vpop.f32.mrb[11].mxu0  ;;  %1332 = vmatpush1.bf16.msra.mxu1 %v1331_v53  ;;  %v544_v59 = vpop.permute.xlu1 %543 }
 0x137   : > { %v655_v63 = vadd.f32 %v654_v62, %v504_v58 }
 0x138   : > { %v727_v1 = vmax.f32 %v653_v61, 0.0 }
 0x139   : > { %v728_v3 = vmax.f32 %v655_v63, 0.0  ;;  %v658_v4 = vpop.f32.mrb[12].mxu0 }
 0x13a   : > { %v1335_v5 = vpack.c.bf16 %v727_v1, %v725_v0  ;;  %v660_v6 = vpop.f32.mrb[13].mxu0  ;;  %v659_v9 = vadd.f32 %v658_v4, %v509_v7 }
 0x13b   : > { %v1333_v8 = vpack.c.bf16 %v728_v3, %v726_v2  ;;  %v661_v11 = vadd.f32 %v660_v6, %v509_v7 }
 0x13c   : > { %v729_v16 = vmax.f32 %v659_v9, 0.0 }
 0x13d   : > { %v664_v12 = vpop.f32.mrb[14].mxu0  ;;  %1334 = vmatprep.subr.bf16.mxu1 %v1333_v8  ;;  %v730_v18 = vmax.f32 %v661_v11, 0.0  ;;  %v549_v8 = vpop.permute.xlu0 %548 }
 0x13e   : > { %v665_v13 = vadd.f32 %v664_v12, %v514_v10  ;;  %v666_v14 = vpop.f32.mrb[15].mxu0  ;;  %1336 = vmatpush1.bf16.msra.mxu1 %v1335_v5  ;;  %v554_v11 = vpop.permute.xlu1 %553 }
 0x13f   : > { %v667_v15 = vadd.f32 %v666_v14, %v514_v10 }
 0x140   : > { %v731_v17 = vmax.f32 %v665_v13, 0.0 }
 0x141   : > { %v732_v19 = vmax.f32 %v667_v15, 0.0  ;;  %v670_v20 = vpop.f32.mrb[16].mxu0 }
 0x142   : > { %v1339_v21 = vpack.c.bf16 %v731_v17, %v729_v16  ;;  %v672_v22 = vpop.f32.mrb[17].mxu0  ;;  %v671_v25 = vadd.f32 %v670_v20, %v519_v23 }
 0x143   : > { %v1337_v24 = vpack.c.bf16 %v732_v19, %v730_v18  ;;  %v673_v27 = vadd.f32 %v672_v22, %v519_v23  ;;  %v411_v23 = vld [vmem:[%s1905_s3] sm:$0xff] }
 0x144   : > { %v733_v32 = vmax.f32 %v671_v25, 0.0  ;;  %v413_v25 = vld [vmem:[%s1905_s3 + $0x10] sm:$0xff] }
 0x145   : > { %v676_v28 = vpop.f32.mrb[18].mxu0  ;;  %1338 = vmatprep.subr.bf16.mxu1 %v1337_v24  ;;  %v734_v35 = vmax.f32 %v673_v27, 0.0  ;;  %v412_v24 = vld [vmem:[%s1905_s3 + $0x8] sm:$0xff]  ;;  %v415_v27 = vld [vmem:[%s1905_s3 + $0x20] sm:$0xff] }
 0x146   : > { %v677_v29 = vadd.f32 %v676_v28, %v524_v26  ;;  %v678_v30 = vpop.f32.mrb[19].mxu0  ;;  %1340 = vmatpush1.bf16.msra.mxu1 %v1339_v21  ;;  %v416_v28 = vld [vmem:[%s1905_s3 + $0x28] sm:$0xff] }
 0x147   : > { %v679_v31 = vadd.f32 %v678_v30, %v524_v26  ;;  %v414_v26 = vld [vmem:[%s1905_s3 + $0x18] sm:$0xff] }
 0x148   : > { %v735_v34 = vmax.f32 %v677_v29, 0.0  ;;  %v417_v29 = vld [vmem:[%s1905_s3 + $0x30] sm:$0xff]  ;;  %v418_v30 = vld [vmem:[%s1905_s3 + $0x38] sm:$0xff] }
 0x149   : > { %v736_v36 = vmax.f32 %v679_v31, 0.0  ;;  %v682_v37 = vpop.f32.mrb[20].mxu0  ;;  %v419_v31 = vld [vmem:[%s1905_s3 + $0x40] sm:$0xff] }
 0x14a   : > { %v1343_v38 = vpack.c.bf16 %v735_v34, %v733_v32  ;;  %v684_v39 = vpop.f32.mrb[21].mxu0  ;;  %v683_v42 = vadd.f32 %v682_v37, %v529_v40  ;;  %v420_v32 = vld [vmem:[%s1905_s3 + $0x48] sm:$0xff]  ;;  %v421_v34 = vld [vmem:[%s1905_s3 + $0x50] sm:$0xff] }
 0x14b   : > { %v1341_v41 = vpack.c.bf16 %v736_v36, %v734_v35  ;;  %v685_v44 = vadd.f32 %v684_v39, %v529_v40  ;;  %v422_v35 = vld [vmem:[%s1905_s3 + $0x58] sm:$0xff]  ;;  %v423_v36 = vld [vmem:[%s1905_s3 + $0x60] sm:$0xff]  ;;  %v424_v37 = vld [vmem:[%s1905_s3 + $0x68] sm:$0xff]  ;;  %v752_v40 = vpop.permute.xlu0 %751 }
 0x14c   : > { %v737_v49 = vmax.f32 %v683_v42, 0.0  ;;  %v426_v39 = vld [vmem:[%s1905_s3 + $0x78] sm:$0xff] }
 0x14d   : > { %v688_v45 = vpop.f32.mrb[22].mxu0  ;;  %1342 = vmatprep.subr.bf16.mxu1 %v1341_v41  ;;  %v738_v51 = vmax.f32 %v685_v44, 0.0  ;;  %v757_v41 = vpop.permute.xlu1 %756 }
 0x14e   : > { %v689_v46 = vadd.f32 %v688_v45, %v534_v43  ;;  %v690_v47 = vpop.f32.mrb[23].mxu0  ;;  %1344 = vmatpush1.bf16.msra.mxu1 %v1343_v38  ;;  %v425_v38 = vld [vmem:[%s1905_s3 + $0x70] sm:$0xff] }
 0x14f   : > { %v691_v48 = vadd.f32 %v690_v47, %v534_v43  ;;  %v762_v42 = vpop.permute.xlu0 %761 }
 0x150   : > { %v739_v50 = vmax.f32 %v689_v46, 0.0 }
 0x151   : > { %v740_v52 = vmax.f32 %v691_v48, 0.0  ;;  %v694_v53 = vpop.f32.mrb[24].mxu0  ;;  %v767_v43 = vpop.permute.xlu1 %766 }
 0x152   : > { %v1347_v54 = vpack.c.bf16 %v739_v50, %v737_v49  ;;  %v696_v55 = vpop.f32.mrb[25].mxu0  ;;  %v695_v58 = vadd.f32 %v694_v53, %v539_v56 }
 0x153   : > { %v1345_v57 = vpack.c.bf16 %v740_v52, %v738_v51  ;;  %v697_v60 = vadd.f32 %v696_v55, %v539_v56  ;;  %v1025_v44 = vpop.permute.xlu0 %1024 }
 0x154   : > { %v741_v1 = vmax.f32 %v695_v58, 0.0 }
 0x155   : > { %v700_v61 = vpop.f32.mrb[26].mxu0  ;;  %1346 = vmatprep.subr.bf16.mxu1 %v1345_v57  ;;  %v742_v3 = vmax.f32 %v697_v60, 0.0  ;;  %v1030_v45 = vpop.permute.xlu1 %1029 }
 0x156   : > { %v701_v62 = vadd.f32 %v700_v61, %v544_v59  ;;  %v702_v63 = vpop.f32.mrb[27].mxu0  ;;  %1348 = vmatpush1.bf16.msra.mxu1 %v1347_v54 }
 0x157   : > { %v703_v0 = vadd.f32 %v702_v63, %v544_v59  ;;  %v772_v46 = vpop.permute.xlu0 %771 }
 0x158   : > { %v743_v2 = vmax.f32 %v701_v62, 0.0 }
 0x159   : > { %v744_v4 = vmax.f32 %v703_v0, 0.0  ;;  %v706_v5 = vpop.f32.mrb[28].mxu0  ;;  %v1035_v47 = vpop.permute.xlu1 %1034 }
 0x15a   : > { %v1351_v6 = vpack.c.bf16 %v743_v2, %v741_v1  ;;  %v708_v7 = vpop.f32.mrb[29].mxu0  ;;  %v707_v10 = vadd.f32 %v706_v5, %v549_v8 }
 0x15b   : > { %v1349_v9 = vpack.c.bf16 %v744_v4, %v742_v3  ;;  %v709_v12 = vadd.f32 %v708_v7, %v549_v8  ;;  %v777_v48 = vpop.permute.xlu0 %776 }
 0x15c   : > { %v745_v17 = vmax.f32 %v707_v10, 0.0 }
 0x15d   : > { %v712_v13 = vpop.f32.mrb[30].mxu0  ;;  %1350 = vmatprep.subr.bf16.mxu1 %v1349_v9  ;;  %v746_v19 = vmax.f32 %v709_v12, 0.0  ;;  %v1040_v49 = vpop.permute.xlu1 %1039 }
 0x15e   : > { %v713_v14 = vadd.f32 %v712_v13, %v554_v11  ;;  %v714_v15 = vpop.f32.mrb[31].mxu0  ;;  %1352 = vmatpush1.bf16.msra.mxu1 %v1351_v6 }
 0x15f   : > { %v715_v16 = vadd.f32 %v714_v15, %v554_v11  ;;  %v1875_v50 = vpop.permute.xlu0 %781 }
 0x160   : > { %v747_v18 = vmax.f32 %v713_v14, 0.0 }
 0x161   : > { %v748_v20 = vmax.f32 %v715_v16, 0.0  ;;  %v1045_v53 = vpop.permute.xlu1 %1044 }
 0x162   : > { %v1355_v21 = vpack.c.bf16 %v747_v18, %v745_v17 }
 0x163   : > { %v1353_v22 = vpack.c.bf16 %v748_v20, %v746_v19  ;;  %v1877_v59 = vpop.permute.xlu0 %786 }
 0x165   : > { %1354 = vmatprep.subr.bf16.mxu1 %v1353_v22  ;;  %v1050_v63 = vpop.permute.xlu1 %1049 }
 0x166   : > { %1356 = vmatpush1.bf16.msra.mxu1 %v1355_v21 }
 0x167   : > { %v1879_v11 = vpop.permute.xlu0 %791 }
 0x169   : > { %894 = vmatmul.mubr.f32.vlgmr.msra.gmra.mrb[0].mxu1 %v411_v23  ;;  %v1055_v18 = vpop.permute.xlu1 %1054 }
 0x16a   : > { %899 = vmatprep.mubr.f32.mxu1 %v1418_v33 }
 0x16d   : > { %900 = vmatmul.mubr.f32.gmra.mrb[2].mxu1 %v412_v24 }
 0x16e   : > { %905 = vmatprep.mubr.f32.mxu1 %v1418_v33 }
 0x171   : > { %906 = vmatmul.mubr.f32.gmra.mrb[4].mxu1 %v413_v25 }
 0x172   : > { %911 = vmatprep.mubr.f32.mxu1 %v1418_v33 }
 0x175   : > { %912 = vmatmul.mubr.f32.gmra.mrb[6].mxu1 %v414_v26 }
 0x176   : > { %917 = vmatprep.mubr.f32.mxu1 %v1418_v33 }
 0x179   : > { %918 = vmatmul.mubr.f32.gmra.mrb[8].mxu1 %v415_v27 }
 0x17a   : > { %923 = vmatprep.mubr.f32.mxu1 %v1418_v33 }
 0x17d   : > { %924 = vmatmul.mubr.f32.gmra.mrb[10].mxu1 %v416_v28 }
 0x17e   : > { %929 = vmatprep.mubr.f32.mxu1 %v1418_v33 }
 0x181   : > { %930 = vmatmul.mubr.f32.gmra.mrb[12].mxu1 %v417_v29  ;;  %v797_v29 = vpop.permute.xlu0 %796 }
 0x182   : > { %935 = vmatprep.mubr.f32.mxu1 %v1418_v33 }
 0x185   : > { %936 = vmatmul.mubr.f32.gmra.mrb[14].mxu1 %v418_v30 }
 0x186   : > { %941 = vmatprep.mubr.f32.mxu1 %v1418_v33 }
 0x189   : > { %942 = vmatmul.mubr.f32.gmra.mrb[16].mxu1 %v419_v31 }
 0x18a   : > { %947 = vmatprep.mubr.f32.mxu1 %v1418_v33 }
 0x18d   : > { %948 = vmatmul.mubr.f32.gmra.mrb[18].mxu1 %v420_v32 }
 0x18e   : > { %953 = vmatprep.mubr.f32.mxu1 %v1418_v33 }
 0x191   : > { %954 = vmatmul.mubr.f32.gmra.mrb[20].mxu1 %v421_v34 }
 0x192   : > { %959 = vmatprep.mubr.f32.mxu1 %v1418_v33 }
 0x195   : > { %960 = vmatmul.mubr.f32.gmra.mrb[22].mxu1 %v422_v35  ;;  %v1060_v35 = vpop.permute.xlu1 %1059 }
 0x196   : > { %965 = vmatprep.mubr.f32.mxu1 %v1418_v33 }
 0x199   : > { %966 = vmatmul.mubr.f32.gmra.mrb[24].mxu1 %v423_v36 }
 0x19a   : > { %971 = vmatprep.mubr.f32.mxu1 %v1418_v33 }
 0x19d   : > { %972 = vmatmul.mubr.f32.gmra.mrb[26].mxu1 %v424_v37 }
 0x19e   : > { %977 = vmatprep.mubr.f32.mxu1 %v1418_v33 }
 0x1a1   : > { %978 = vmatmul.mubr.f32.gmra.mrb[28].mxu1 %v425_v38 }
 0x1a2   : > { %983 = vmatprep.mubr.f32.mxu1 %v1418_v33 }
 0x1a5   : > { %984 = vmatmul.mubr.f32.gmra.mrb[30].mxu1 %v426_v39 }
 0x23c   : > { %v895_v51 = vpop.f32.mrb[0].mxu1 }
 0x23d   : > { %v896_v52 = vadd.f32 %v895_v51, %v752_v40  ;;  %v897_v33 = vpop.f32.mrb[1].mxu1 }
 0x23e   : > { %v898_v54 = vadd.f32 %v897_v33, %v752_v40 }
 0x23f   : > { %v990_v56 = vmax.f32 %v896_v52, 0.0 }
 0x240   : > { %v901_v55 = vpop.f32.mrb[2].mxu1  ;;  %v991_v60 = vmax.f32 %v898_v54, 0.0 }
 0x241   : > { %v902_v57 = vadd.f32 %v901_v55, %v757_v41  ;;  %v903_v58 = vpop.f32.mrb[3].mxu1  ;;  %v1102_v2 = vmul.f32 %v1025_v44, %v990_v56  ;;  %v1065_v55 = vpop.permute.xlu1 %1064 }
 0x242   : > { %v904_v61 = vadd.f32 %v903_v58, %v757_v41  ;;  %v1103_v6 = vmul.f32 %v1025_v44, %v991_v60 }
 0x243   : > { %v992_v62 = vmax.f32 %v902_v57, 0.0 }
 0x244   : > { %v993_v0 = vmax.f32 %v904_v61, 0.0  ;;  %v907_v1 = vpop.f32.mrb[4].mxu1 }
 0x245   : > { %v1104_v3 = vmul.f32 %v1030_v45, %v992_v62  ;;  %v908_v4 = vadd.f32 %v907_v1, %v762_v42  ;;  %v909_v5 = vpop.f32.mrb[5].mxu1 }
 0x246   : > { %v1105_v7 = vmul.f32 %v1030_v45, %v993_v0  ;;  %v910_v8 = vadd.f32 %v909_v5, %v762_v42 }
 0x247   : > { %v1134_v9 = vadd.f32 %v1104_v3, %v1102_v2  ;;  %v994_v10 = vmax.f32 %v908_v4, 0.0 }
 0x248   : > { %v1155_v12 = vadd.f32 %v1105_v7, %v1103_v6  ;;  %v995_v13 = vmax.f32 %v910_v8, 0.0  ;;  %v913_v14 = vpop.f32.mrb[6].mxu1  ;;  %v1070_v7 = vpop.permute.xlu1 %1069 }
 0x249   : > { %v1106_v15 = vmul.f32 %v1035_v47, %v994_v10  ;;  %v914_v16 = vadd.f32 %v913_v14, %v767_v43  ;;  %v915_v17 = vpop.f32.mrb[7].mxu1 }
 0x24a   : > { %v1107_v19 = vmul.f32 %v1035_v47, %v995_v13  ;;  %v916_v20 = vadd.f32 %v915_v17, %v767_v43  ;;  %v802_v47 = vpop.permute.xlu0 %801 }
 0x24b   : > { %v1135_v21 = vadd.f32 %v1134_v9, %v1106_v15  ;;  %v996_v22 = vmax.f32 %v914_v16, 0.0 }
 0x24c   : > { %v1156_v23 = vadd.f32 %v1155_v12, %v1107_v19  ;;  %v997_v24 = vmax.f32 %v916_v20, 0.0  ;;  %v919_v25 = vpop.f32.mrb[8].mxu1 }
 0x24d   : > { %v1108_v26 = vmul.f32 %v1040_v49, %v996_v22  ;;  %v920_v27 = vadd.f32 %v919_v25, %v772_v46  ;;  %v921_v28 = vpop.f32.mrb[9].mxu1 }
 0x24e   : > { %v1109_v30 = vmul.f32 %v1040_v49, %v997_v24  ;;  %v922_v31 = vadd.f32 %v921_v28, %v772_v46  ;;  %v807_v2 = vpop.permute.xlu0 %806 }
 0x24f   : > { %v1136_v32 = vadd.f32 %v1135_v21, %v1108_v26  ;;  %v998_v34 = vmax.f32 %v920_v27, 0.0 }
 0x250   : > { %v1157_v36 = vadd.f32 %v1156_v23, %v1109_v30  ;;  %v999_v37 = vmax.f32 %v922_v31, 0.0  ;;  %v925_v38 = vpop.f32.mrb[10].mxu1  ;;  %v1075_v23 = vpop.permute.xlu1 %1074 }
 0x251   : > { %v1110_v39 = vmul.f32 %v1045_v53, %v998_v34  ;;  %v926_v40 = vadd.f32 %v925_v38, %v777_v48  ;;  %v927_v41 = vpop.f32.mrb[11].mxu1 }
 0x252   : > { %v1111_v42 = vmul.f32 %v1045_v53, %v999_v37  ;;  %v928_v43 = vadd.f32 %v927_v41, %v777_v48  ;;  %v812_v17 = vpop.permute.xlu0 %811 }
 0x253   : > { %v1137_v44 = vadd.f32 %v1136_v32, %v1110_v39  ;;  %v1000_v45 = vmax.f32 %v926_v40, 0.0 }
 0x254   : > { %v1158_v51 = vadd.f32 %v1157_v36, %v1111_v42  ;;  %v1001_v52 = vmax.f32 %v928_v43, 0.0  ;;  %v931_v33 = vpop.f32.mrb[12].mxu1  ;;  %v1080_v40 = vpop.permute.xlu1 %1079 }
 0x255   : > { %v1112_v54 = vmul.f32 %v1050_v63, %v1000_v45  ;;  %v932_v46 = vadd.f32 %v931_v33, %v1875_v50  ;;  %v933_v49 = vpop.f32.mrb[13].mxu1 }
 0x256   : > { %v1113_v56 = vmul.f32 %v1050_v63, %v1001_v52  ;;  %v934_v57 = vadd.f32 %v933_v49, %v1875_v50 }
 0x257   : > { %v1138_v58 = vadd.f32 %v1137_v44, %v1112_v54  ;;  %v1002_v60 = vmax.f32 %v932_v46, 0.0 }
 0x258   : > { %v1159_v61 = vadd.f32 %v1158_v51, %v1113_v56  ;;  %v1003_v62 = vmax.f32 %v934_v57, 0.0  ;;  %v937_v53 = vpop.f32.mrb[14].mxu1 }
 0x259   : > { %v1114_v48 = vmul.f32 %v1055_v18, %v1002_v60  ;;  %v938_v0 = vadd.f32 %v937_v53, %v1877_v59  ;;  %v939_v1 = vpop.f32.mrb[15].mxu1  ;;  %v1085_v60 = vpop.permute.xlu1 %1084 }
 0x25a   : > { %v1115_v3 = vmul.f32 %v1055_v18, %v1003_v62  ;;  %v940_v4 = vadd.f32 %v939_v1, %v1877_v59 }
 0x25b   : > { %v1139_v5 = vadd.f32 %v1138_v58, %v1114_v48  ;;  %v1004_v6 = vmax.f32 %v938_v0, 0.0 }
 0x25c   : > { %v1160_v8 = vadd.f32 %v1159_v61, %v1115_v3  ;;  %v1005_v63 = vmax.f32 %v940_v4, 0.0  ;;  %v943_v9 = vpop.f32.mrb[16].mxu1 }
 0x25d   : > { %v1116_v50 = vmul.f32 %v1060_v35, %v1004_v6  ;;  %v944_v10 = vadd.f32 %v943_v9, %v1879_v11  ;;  %v945_v12 = vpop.f32.mrb[17].mxu1 }
 0x25e   : > { %v1117_v13 = vmul.f32 %v1060_v35, %v1005_v63  ;;  %v946_v14 = vadd.f32 %v945_v12, %v1879_v11  ;;  %v817_v35 = vpop.permute.xlu0 %816 }
 0x25f   : > { %v1140_v15 = vadd.f32 %v1139_v5, %v1116_v50  ;;  %v1006_v16 = vmax.f32 %v944_v10, 0.0  ;;  %v1090_v50 = vpop.permute.xlu1 %1089 }
 0x260   : > { %v1161_v19 = vadd.f32 %v1160_v8, %v1117_v13  ;;  %v1007_v18 = vmax.f32 %v946_v14, 0.0  ;;  %v949_v20 = vpop.f32.mrb[18].mxu1 }
 0x261   : > { %v1118_v59 = vmul.f32 %v1065_v55, %v1006_v16  ;;  %v950_v21 = vadd.f32 %v949_v20, %v797_v29  ;;  %v951_v22 = vpop.f32.mrb[19].mxu1 }
 0x262   : > { %v1119_v24 = vmul.f32 %v1065_v55, %v1007_v18  ;;  %v952_v25 = vadd.f32 %v951_v22, %v797_v29  ;;  %v822_v46 = vpop.permute.xlu0 %821 }
 0x263   : > { %v1141_v26 = vadd.f32 %v1140_v15, %v1118_v59  ;;  %v1008_v27 = vmax.f32 %v950_v21, 0.0 }
 0x264   : > { %v1162_v28 = vadd.f32 %v1161_v19, %v1119_v24  ;;  %v1009_v30 = vmax.f32 %v952_v25, 0.0  ;;  %v955_v31 = vpop.f32.mrb[20].mxu1 }
 0x265   : > { %v1120_v32 = vmul.f32 %v1070_v7, %v1008_v27  ;;  %v956_v34 = vadd.f32 %v955_v31, %v802_v47  ;;  %v957_v11 = vpop.f32.mrb[21].mxu1 }
 0x266   : > { %v1121_v36 = vmul.f32 %v1070_v7, %v1009_v30  ;;  %v958_v37 = vadd.f32 %v957_v11, %v802_v47  ;;  %v827_v6 = vpop.permute.xlu0 %826 }
 0x267   : > { %v1142_v38 = vadd.f32 %v1141_v26, %v1120_v32  ;;  %v1010_v39 = vmax.f32 %v956_v34, 0.0  ;;  %v1100_v32 = vpop.permute.xlu1 %1099 }
 0x268   : > { %v1163_v41 = vadd.f32 %v1162_v28, %v1121_v36  ;;  %v1011_v42 = vmax.f32 %v958_v37, 0.0  ;;  %v961_v43 = vpop.f32.mrb[22].mxu1  ;;  %v1181_v37 = vlaneseq }
 0x269   : > { %v1122_v44 = vmul.f32 %v1075_v23, %v1010_v39  ;;  %v962_v45 = vadd.f32 %v961_v43, %v807_v2  ;;  %v963_v29 = vpop.f32.mrb[23].mxu1 }
 0x26a   : > { %v1123_v51 = vmul.f32 %v1075_v23, %v1011_v42  ;;  %v964_v52 = vadd.f32 %v963_v29, %v807_v2  ;;  %v1095_v59 = vpop.permute.xlu0 %1094  ;;  %v1182_v42 = vshrl.u32 %v1181_v37, 7  ;;  %vm1219_vm0 = vcmp.lt.s32.totalorder %v1181_v37, 256 }
 0x26b   : > { %v1143_v33 = vadd.f32 %v1142_v38, %v1122_v44  ;;  %v1012_v54 = vmax.f32 %v962_v45, 0.0 }
 0x26c   : > { %v1164_v49 = vadd.f32 %v1163_v41, %v1123_v51  ;;  %v1013_v55 = vmax.f32 %v964_v52, 0.0  ;;  %v967_v56 = vpop.f32.mrb[24].mxu1  ;;  %v1183_v51 = vsub.s32 0, %v1182_v42 }
 0x26d   : > { %v1124_v57 = vmul.f32 %v1080_v40, %v1012_v54  ;;  %v968_v58 = vadd.f32 %v967_v56, %v812_v17  ;;  %v969_v47 = vpop.f32.mrb[25].mxu1 }
 0x26e   : > { %v1125_v61 = vmul.f32 %v1080_v40, %v1013_v55  ;;  %v970_v62 = vadd.f32 %v969_v47, %v812_v17 }
 0x26f   : > { %v1144_v53 = vadd.f32 %v1143_v33, %v1124_v57  ;;  %v1014_v48 = vmax.f32 %v968_v58, 0.0  ;;  %v1179_v33 = vpop.permute.xlu0 %1178 }
 0x270   : > { %v1165_v0 = vadd.f32 %v1164_v49, %v1125_v61  ;;  %v1015_v1 = vmax.f32 %v970_v62, 0.0  ;;  %v973_v3 = vpop.f32.mrb[26].mxu1  ;;  %v1184_v55 = vrot.slane %v1179_v33, %v1183_v51 }
 0x271   : > { %v1126_v4 = vmul.f32 %v1085_v60, %v1014_v48  ;;  %v974_v5 = vadd.f32 %v973_v3, %v817_v35  ;;  %v975_v2 = vpop.f32.mrb[27].mxu1 }
 0x272   : > { %v1127_v7 = vmul.f32 %v1085_v60, %v1015_v1  ;;  %v976_v8 = vadd.f32 %v975_v2, %v817_v35  ;;  %v1420_v1 = vmov 1966171168  }
 0x273   : > { %v1145_v63 = vadd.f32 %v1144_v53, %v1126_v4  ;;  %v1016_v9 = vmax.f32 %v974_v5, 0.0  ;;  %v1203_v3 = vunpack.c.l.s4 %v1420_v1 }
 0x274   : > { %v1166_v10 = vadd.f32 %v1165_v0, %v1127_v7  ;;  %v1017_v12 = vmax.f32 %v976_v8, 0.0  ;;  %v979_v13 = vpop.f32.mrb[28].mxu1 }
 0x275   : > { %v1128_v14 = vmul.f32 %v1090_v50, %v1016_v9  ;;  %v980_v15 = vadd.f32 %v979_v13, %v822_v46  ;;  %v981_v16 = vpop.f32.mrb[29].mxu1  ;;  %v1204_v4 = vunpack.c.0.s8 %v1203_v3 }
 0x276   : > { %v1129_v17 = vmul.f32 %v1090_v50, %v1017_v12  ;;  %v982_v19 = vadd.f32 %v981_v16, %v822_v46 }
 0x277   : > { %v1146_v18 = vadd.f32 %v1145_v63, %v1128_v14  ;;  %v1018_v20 = vmax.f32 %v980_v15, 0.0  ;;  %v1207_v2 = vsub.s32 %v1204_v4, %v1182_v42 }
 0x278   : > { %v1167_v21 = vadd.f32 %v1166_v10, %v1129_v17  ;;  %v1019_v22 = vmax.f32 %v982_v19, 0.0  ;;  %v985_v23 = vpop.f32.mrb[30].mxu1 }
 0x279   : > { %v1130_v24 = vmul.f32 %v1095_v59, %v1018_v20  ;;  %v986_v25 = vadd.f32 %v985_v23, %v827_v6  ;;  %v987_v26 = vpop.f32.mrb[31].mxu1 }
 0x27a   : > { %v1131_v27 = vmul.f32 %v1095_v59, %v1019_v22  ;;  %v988_v28 = vadd.f32 %v987_v26, %v827_v6 }
 0x27b   : > { %v1147_v30 = vadd.f32 %v1146_v18, %v1130_v24  ;;  %v1020_v31 = vmax.f32 %v986_v25, 0.0 }
 0x27c   : > { %v1168_v34 = vadd.f32 %v1167_v21, %v1131_v27  ;;  %v1021_v11 = vmax.f32 %v988_v28, 0.0 }
 0x27d   : > { %v1132_v35 = vmul.f32 %v1100_v32, %v1020_v31 }
 0x27e   : > { %v1133_v36 = vmul.f32 %v1100_v32, %v1021_v11 }
 0x27f   : > { %v1148_v38 = vadd.f32 %v1147_v30, %v1132_v35 }
 0x280   : > { %v1169_v39 = vadd.f32 %v1168_v34, %v1133_v36 }
 0x281   : > { %v1149_v40 = vrot.slane %v1148_v38, 4 }
 0x282   : > { %v1170_v41 = vrot.slane %v1169_v39, 4 }
 0x283   : > { %v1150_v43 = vadd.f32 %v1149_v40, %v1148_v38 }
 0x284   : > { %v1171_v44 = vadd.f32 %v1170_v41, %v1169_v39 }
 0x285   : > { %v1151_v45 = vrot.slane %v1150_v43, 2 }
 0x286   : > { %v1172_v29 = vrot.slane %v1171_v44, 2 }
 0x287   : > { %v1152_v52 = vadd.f32 %v1151_v45, %v1150_v43 }
 0x288   : > { %v1173_v54 = vadd.f32 %v1172_v29, %v1171_v44 }
 0x289   : > { %v1153_v46 = vrot.slane %v1152_v52, 1 }
 0x28a   : > { %v1174_v49 = vrot.slane %v1173_v54, 1 }
 0x28b   : > { %v1154_v56 = vadd.f32 %v1153_v46, %v1152_v52 }
 0x28c   : > { %v1175_v57 = vadd.f32 %v1174_v49, %v1173_v54 }
 0x28d   : > { %v1185_v58 = vadd.f32 %v1184_v55, %v1154_v56 }
 0x28e   : > { %v1186_v47 = vadd.f32 %v1184_v55, %v1175_v57 }
 0x28f   : > { %v1288_v60 = vmul.f32 -1.442695, %v1185_v58 }
 0x290   : > { %v1289_v61 = vmul.f32 -1.442695, %v1186_v47 }
 0x291   : > { %1386 = vpow2.f32 %v1288_v60 }
 0x292   : > { %1388 = vpow2.f32 %v1289_v61 }
 0x29b   : > { %v1387_v62 = vpop.eup %1386 }
 0x29c   : > { %v1389_v53 = vpop.eup %1388  ;;  %v1193_v48 = vadd.f32 1.0, %v1387_v62 }
 0x29d   : > { %v1194_v0 = vadd.f32 1.0, %v1389_v53 }
 0x29e   : > { %1390 = vrcp.f32 %v1193_v48 }
 0x29f   : > { %1392 = vrcp.f32 %v1194_v0 }
 0x2a8   : > { %v1391_v5 = vpop.eup %1390 }
 0x2a9   : > { %v1393_v6 = vpop.eup %1392 }
 0x2aa   : > { %v1201_v7 = vcombine.low %v1391_v5, %v1393_v6 }
 0x2ac   : > { %v1208_v8 = vrot.slane %v1201_v7, %v1207_v2 }
 0x2ae   : > { %v1215_v63 = vrot.slane %v1208_v8, %v1207_v2 }
 0x2b0   : > { %1221 = vst.msk [vmem:[%s361_s12] sm:$0x3] %vm1219_vm0, %v1215_v63 }
 0x2b1 PF: > { %p16_p9 = scmp.ge.s32.totalorder %s1481_s29, 4   ;;  %s1910_s26 = smov %s1412_s27 }
 0x2b2   : > { %s1911_s27 = smov %s1490_s9  ;;  %s1912_s28 = smov %s1481_s29 }
 0x2b3   :  { %18 = sbr.rel (!%p16_p9) target bundleno = 5 (0x5), region = 106 }

</bundles_post_ra>
